<compile_context>
chip_gen: v7x
topology: tpu7x:2x2x1
jax: 0.10.0
libtpu: 0.0.40
codegen_flags: <defaults>
</compile_context>

<pallas_src>
import jax
import jax.numpy as jnp
from jax import lax
from jax.experimental import pallas as pl
from jax.experimental.pallas import tpu as pltpu

N_S = 2
N_A = 1
HIDDEN = 200


def _round_up(x, m):
    return ((x + m - 1) // m) * m


def _vmem_capacity_bytes(default=64 * 1024 * 1024):
    """Queried VMEM capacity with a conservative (v7x-sized) fallback."""
    try:
        return int(pltpu.get_tpu_info().vmem_capacity_bytes)
    except Exception:
        return default


# Conservative bound on simultaneously-live (HP, TB) f32 temporaries inside the
# kernel (fc1 chain, relu6, per-action product, reduction temps, pipelined IO).
_LIVE_TEMPS = 10


def _pick_tile(B, HP, max_batch_tile):
    """Batch-tile size (lanes) + optional vmem_limit_bytes, VMEM-budgeted."""
    cap = _vmem_capacity_bytes()
    budget = int(cap * 0.6)                               # compiler headroom
    tb_cap = max(128, (budget // (_LIVE_TEMPS * HP * 4)) // 128 * 128)
    if B <= max_batch_tile and B <= tb_cap:
        tb = B                       # single full-dim block: no padding at all
    else:
        tb = max(128, (min(max_batch_tile, tb_cap) // 128) * 128)
    est = _LIVE_TEMPS * HP * 4 * tb
    vmem_limit = None
    if est > 16 * 1024 * 1024:       # beyond v5e's conservative scoped default
        vmem_limit = int(min(budget, max(est, 32 * 1024 * 1024)))
    return tb, vmem_limit


def _actor_kernel(s_ref, w_ref, out_ref):
    st = s_ref[...]                       # (N_S, TB)   batch in lanes
    w = w_ref[...]                        # (HP, NW)    packed parameters
    n_s = st.shape[0]
    n_a = out_ref.shape[0]
    nw = w.shape[1]

    # fc1: h[j, b] = b1[j] + sum_k w1[j, k] * s[b, k]             -> (HP, TB)
    # Each term: once-per-tile lane-broadcast of a parameter column times a
    # sublane-broadcast of an s row; K = N_S = 2 is a static VPU unroll.
    h = w[:, n_s:n_s + 1] + w[:, 0:1] * st[0:1, :]
    for k in range(1, n_s):
        h = h + w[:, k:k + 1] * st[k:k + 1, :]
    h = jnp.minimum(jnp.maximum(h, 0.0), 6.0)                     # relu6

    # fc2: logits[a, b] = b2[a] + sum_j w2[a, j] * h[j, b].  The hidden
    # contraction is a sublane-axis reduction (VALU tree-adds across the
    # sublane-vreg rows + one intra-vreg sublane reduce), not a lane reduce.
    cols = [jnp.sum(h * w[:, n_s + 1 + a:n_s + 2 + a], axis=0, keepdims=True)
            for a in range(n_a)]
    logits = cols[0] if n_a == 1 else jnp.concatenate(cols, axis=0)
    logits = logits + w[0:n_a, nw - 1:nw]                         # + b2

    # Softmax over the action axis (axis 0 in this layout).  Degenerate
    # (== 1.0) for N_A == 1 but kept to preserve the module's semantics.
    m = jnp.max(logits, axis=0, keepdims=True)
    e = jnp.exp(logits - m)
    denom = jnp.sum(e, axis=0, keepdims=True)
    # approx=False keeps the generic N_A>1 path inside a 1e-5 tolerance;
    # pl.reciprocal still keeps the divide off the VALU critical path.
    out_ref[...] = e * pl.reciprocal(denom, approx=False)


def actor_forward(s, w1, b1, w2, b2, *, max_batch_tile=4096):
    """softmax(relu6(s @ w1.T + b1) @ w2.T + b2).

    s: (B, N_S); w1: (HIDDEN, N_S); b1: (HIDDEN,); w2: (N_A, HIDDEN); b2: (N_A,).
    Returns (B, N_A) float32.
    """
    B, n_s = s.shape
    hidden = w1.shape[0]
    n_a = w2.shape[0]
    HP = _round_up(hidden, 8)            # sublane-align hidden (200 -> 200)
    NW = n_s + 1 + n_a + 1               # [w1 cols | b1 | w2 rows-as-cols | b2]

    # Pack every parameter into one (HP, NW) operand (single DMA chain,
    # VMEM-resident across the batch grid).  Padded hidden rows are zero, so
    # the HP-row contraction equals the HIDDEN-row one exactly.
    W = jnp.zeros((HP, NW), jnp.float32)
    W = W.at[:hidden, :n_s].set(w1.astype(jnp.float32))
    W = W.at[:hidden, n_s].set(b1.astype(jnp.float32))
    W = W.at[:hidden, n_s + 1:n_s + 1 + n_a].set(w2.T.astype(jnp.float32))
    W = W.at[:n_a, NW - 1].set(b2.astype(jnp.float32))

    st = s.astype(jnp.float32).T         # (N_S, B): batch in lanes, no pad copy

    TB, vmem_limit = _pick_tile(B, HP, max_batch_tile)
    grid = (pl.cdiv(B, TB),)             # ragged last block: columns are
                                         # independent, OOB stores are dropped

    cp_kwargs = {"dimension_semantics": ("parallel",)}
    if vmem_limit is not None:
        cp_kwargs["vmem_limit_bytes"] = vmem_limit

    out_t = pl.pallas_call(
        _actor_kernel,
        out_shape=jax.ShapeDtypeStruct((n_a, B), jnp.float32),
        grid=grid,
        in_specs=[
            pl.BlockSpec((n_s, TB), lambda i: (0, i)),   # s^T: tiled over batch
            pl.BlockSpec((HP, NW), lambda i: (0, 0)),    # packed params: resident
        ],
        out_specs=pl.BlockSpec((n_a, TB), lambda i: (0, i)),  # lane-dense store
        compiler_params=pltpu.CompilerParams(**cp_kwargs),
    )(st, W)
    return out_t.T                       # (B, N_A)


def init_params(key):
    k1, k2, k3, k4 = jax.random.split(key, 4)
    # weights ~ Normal(0, 0.6) as in the PyTorch __init__
    w1 = 0.6 * jax.random.normal(k1, (HIDDEN, N_S), dtype=jnp.float32)
    w2 = 0.6 * jax.random.normal(k2, (N_A, HIDDEN), dtype=jnp.float32)
    # biases: nn.Linear default U(-1/sqrt(fan_in), 1/sqrt(fan_in))
    b1 = jax.random.uniform(k3, (HIDDEN,), dtype=jnp.float32,
                            minval=-1.0 / jnp.sqrt(N_S), maxval=1.0 / jnp.sqrt(N_S))
    b2 = jax.random.uniform(k4, (N_A,), dtype=jnp.float32,
                            minval=-1.0 / jnp.sqrt(HIDDEN), maxval=1.0 / jnp.sqrt(HIDDEN))
    return w1, b1, w2, b2


def _reference(s, w1, b1, w2, b2):
    hp = lax.Precision.HIGHEST           # keep the f32 reference actually f32
    h = jnp.clip(jnp.dot(s, w1.T, precision=hp) + b1, 0.0, 6.0)
    logits = jnp.dot(h, w2.T, precision=hp) + b2
    return jax.nn.softmax(logits, axis=-1)


if __name__ == "__main__":
    key = jax.random.PRNGKey(0)
    kp, ks, ke = jax.random.split(key, 3)
    w1, b1, w2, b2 = init_params(kp)

    # (1) The module as specified: N_S=2 -> 200 -> N_A=1, small batch
    #     (single full-dim block path).
    B = 8
    s = jax.random.normal(ks, (B, N_S), dtype=jnp.float32)
    out = jax.block_until_ready(actor_forward(s, w1, b1, w2, b2))
    ref = _reference(s, w1, b1, w2, b2)
    assert out.shape == (B, N_A)
    assert jnp.allclose(out, ref, atol=1e-5, rtol=1e-5)

    # (2) Exercise the tiled path (batch grid, ragged last block, no pad copy)
    #     and the generic N_A > 1 fc2 + softmax so the non-degenerate math is
    #     validated as well.
    B2, NA2 = 300, 4
    k1, k2, k3 = jax.random.split(ke, 3)
    s2 = jax.random.normal(k1, (B2, N_S), dtype=jnp.float32)
    w2b = 0.6 * jax.random.normal(k2, (NA2, HIDDEN), dtype=jnp.float32)
    b2b = 0.1 * jax.random.normal(k3, (NA2,), dtype=jnp.float32)
    out2 = jax.block_until_ready(
        actor_forward(s2, w1, b1, w2b, b2b, max_batch_tile=128))
    ref2 = _reference(s2, w1, b1, w2b, b2b)
    assert out2.shape == (B2, NA2)
    assert jnp.allclose(out2, ref2, atol=5e-5, rtol=5e-5)

    print("KERNEL_OK")
</pallas_src>

<mosaic_0001>
module attributes {stable_mosaic.version = 11 : i64} {
  func.func @_actor_kernel(%arg0: i32, %arg1: memref<2x8xf32, #tpu.memory_space<vmem>>, %arg2: memref<200x5xf32, #tpu.memory_space<vmem>>, %arg3: memref<1x8xf32, #tpu.memory_space<vmem>>) attributes {dimension_semantics = [#tpu.dimension_semantics<parallel>], iteration_bounds = array<i64: 1>, scalar_prefetch = 0 : i64, scratch_operands = 0 : i64, tpu.core_type = #tpu.core_type<tc>, window_params = [{transform_indices = @transform_0, window_bounds = array<i64: 2, 8>}, {pipeline_mode = #tpu.pipeline_mode<synchronous>, transform_indices = @transform_1, window_bounds = array<i64: 200, 5>}, {transform_indices = @transform_2, window_bounds = array<i64: 1, 8>}]} {
    %c0 = arith.constant 0 : index
    %c0_0 = arith.constant 0 : index
    %0 = vector.load %arg1[%c0, %c0_0] : memref<2x8xf32, #tpu.memory_space<vmem>>, vector<2x8xf32>
    %c0_1 = arith.constant 0 : index
    %c0_2 = arith.constant 0 : index
    %1 = vector.load %arg2[%c0_1, %c0_2] : memref<200x5xf32, #tpu.memory_space<vmem>>, vector<200x5xf32>
    %2 = vector.extract_strided_slice %1 {offsets = [0, 2], sizes = [200, 1], strides = [1, 1]} : vector<200x5xf32> to vector<200x1xf32>
    %3 = vector.extract_strided_slice %1 {offsets = [0, 0], sizes = [200, 1], strides = [1, 1]} : vector<200x5xf32> to vector<200x1xf32>
    %4 = vector.extract_strided_slice %0 {offsets = [0, 0], sizes = [1, 8], strides = [1, 1]} : vector<2x8xf32> to vector<1x8xf32>
    %5 = vector.broadcast %3 : vector<200x1xf32> to vector<200x8xf32>
    %6 = vector.broadcast %4 : vector<1x8xf32> to vector<200x8xf32>
    %7 = arith.mulf %5, %6 : vector<200x8xf32>
    %8 = vector.broadcast %2 : vector<200x1xf32> to vector<200x8xf32>
    %9 = arith.addf %8, %7 : vector<200x8xf32>
    %10 = vector.extract_strided_slice %1 {offsets = [0, 1], sizes = [200, 1], strides = [1, 1]} : vector<200x5xf32> to vector<200x1xf32>
    %11 = vector.extract_strided_slice %0 {offsets = [1, 0], sizes = [1, 8], strides = [1, 1]} : vector<2x8xf32> to vector<1x8xf32>
    %12 = vector.broadcast %10 : vector<200x1xf32> to vector<200x8xf32>
    %13 = vector.broadcast %11 : vector<1x8xf32> to vector<200x8xf32>
    %14 = arith.mulf %12, %13 : vector<200x8xf32>
    %15 = arith.addf %9, %14 : vector<200x8xf32>
    %cst = arith.constant 0.000000e+00 : f32
    %16 = vector.broadcast %cst : f32 to vector<200x8xf32>
    %17 = arith.maximumf %15, %16 : vector<200x8xf32>
    %cst_3 = arith.constant 6.000000e+00 : f32
    %18 = vector.broadcast %cst_3 : f32 to vector<200x8xf32>
    %19 = arith.minimumf %17, %18 : vector<200x8xf32>
    %20 = vector.extract_strided_slice %1 {offsets = [0, 3], sizes = [200, 1], strides = [1, 1]} : vector<200x5xf32> to vector<200x1xf32>
    %21 = vector.broadcast %20 : vector<200x1xf32> to vector<200x8xf32>
    %22 = arith.mulf %19, %21 : vector<200x8xf32>
    %cst_4 = arith.constant dense<0.000000e+00> : vector<8xf32>
    %23 = vector.multi_reduction <add>, %22, %cst_4 [0] : vector<200x8xf32> to vector<8xf32>
    %24 = vector.shape_cast %23 : vector<8xf32> to vector<1x8xf32>
    %25 = vector.extract_strided_slice %1 {offsets = [0, 4], sizes = [1, 1], strides = [1, 1]} : vector<200x5xf32> to vector<1x1xf32>
    %26 = vector.broadcast %25 : vector<1x1xf32> to vector<1x8xf32>
    %27 = arith.addf %24, %26 : vector<1x8xf32>
    %cst_5 = arith.constant dense<0xFF800000> : vector<8xf32>
    %28 = vector.multi_reduction <maximumf>, %27, %cst_5 [0] : vector<1x8xf32> to vector<8xf32>
    %29 = vector.shape_cast %28 : vector<8xf32> to vector<1x8xf32>
    %30 = arith.subf %27, %29 : vector<1x8xf32>
    %31 = math.exp %30 : vector<1x8xf32>
    %cst_6 = arith.constant dense<0.000000e+00> : vector<8xf32>
    %32 = vector.multi_reduction <add>, %31, %cst_6 [0] : vector<1x8xf32> to vector<8xf32>
    %33 = vector.shape_cast %32 : vector<8xf32> to vector<1x8xf32>
    %34 = tpu.reciprocal %33 : vector<1x8xf32> -> vector<1x8xf32>
    %35 = arith.mulf %31, %34 : vector<1x8xf32>
    %c0_7 = arith.constant 0 : index
    %c0_8 = arith.constant 0 : index
    %36 = vector.load %arg3[%c0_7, %c0_8] : memref<1x8xf32, #tpu.memory_space<vmem>>, vector<1x8xf32>
    tpu.vector_store %arg3[%c0_7, %c0_8], %35 {strides = array<i32>} : memref<1x8xf32, #tpu.memory_space<vmem>>, vector<1x8xf32>,
    return
  }
  func.func @transform_0(%arg0: i32) -> (i32, i32) {
    %c0_i32 = arith.constant 0 : i32
    %c0_i32_0 = arith.constant 0 : i32
    return %c0_i32, %arg0 : i32, i32
  }
  func.func @transform_1(%arg0: i32) -> (i32, i32) {
    %c0_i32 = arith.constant 0 : i32
    %c0_i32_0 = arith.constant 0 : i32
    %c0_i32_1 = arith.constant 0 : i32
    return %c0_i32, %c0_i32_0 : i32, i32
  }
  func.func @transform_2(%arg0: i32) -> (i32, i32) {
    %c0_i32 = arith.constant 0 : i32
    %c0_i32_0 = arith.constant 0 : i32
    return %c0_i32, %arg0 : i32, i32
  }
}

</mosaic_0001>

<bundles_post_ra>
// kernel: tpu_custom_call.1
= control target key start
LH: loop header
LB: loop body
LE: loop exit
PB: predicated region body
PF: predicated region fallthrough
CT: control target
= control target key end

     0   :  { %v775_v2 = vmov 0   ;;  %s1262_s0 = inlined_call_operand.vmem [shape: f32[2,8], index: 0, kind: input, shape index: {}]   ;;  %s1263_s1 = inlined_call_operand.vmem [shape: f32[200,5], index: 1, kind: input, shape index: {}]   ;;  %s1264_s2 = inlined_call_operand.hbm [shape: f32[1,8], index: 2, kind: output, shape index: {}]  }
   0x1   :  { %v799_v0 = vld [vmem:[%s1263_s1 + $0x10] sm:$0xff]  ;;  %v804_v1 = vld [vmem:[%s1263_s1] sm:$0xff]  ;;  %736 = vset.pattern.permute.xlu1 %v775_v2  ;;  %735 = vset.pattern.permute.xlu0 %v775_v2  ;;  %v811_v3 = vld [vmem:[%s1263_s1 + $0x18] sm:$0xff] }
   0x2   :  { %50 = vperm.xlu1 %736, %v799_v0   ;;  %40 = vperm.xlu0 %735, %v804_v1   ;;  %v816_v4 = vld [vmem:[%s1263_s1 + $0x8] sm:$0xff]  ;;  %v828_v6 = vld [vmem:[%s1263_s1 + $0x20] sm:$0xff] }
   0x3   :  { %v823_v5 = vld [vmem:[%s1263_s1 + $0x28] sm:$0xff] }
   0x6   :  { %55 = vperm.xlu1 %736, %v811_v3   ;;  %45 = vperm.xlu0 %735, %v816_v4  }
   0x7   :  { %7 = vsyncpa [#allocation3], 0  ;;  %v835_v7 = vld [vmem:[%s1263_s1 + $0x38] sm:$0xff]  ;;  %v840_v8 = vld [vmem:[%s1263_s1 + $0x30] sm:$0xff]  ;;  %v776_v26 = vmov 2   ;;  %v777_v27 = vmov 1   ;;  %v163_v47 = vlaneseq }
   0x8   :  { %v847_v9 = vld [vmem:[%s1263_s1 + $0x48] sm:$0xff]  ;;  %v852_v10 = vld [vmem:[%s1263_s1 + $0x40] sm:$0xff]  ;;  %v859_v11 = vld [vmem:[%s1263_s1 + $0x58] sm:$0xff]  ;;  %v778_v28 = vmov 3   ;;  %vm646_vm0 = vcmask 64512   ;;  %vm713_vm1 = vcmask 57344  }
   0x9   :  { %v864_v12 = vld [vmem:[%s1263_s1 + $0x50] sm:$0xff]  ;;  %v871_v13 = vld [vmem:[%s1263_s1 + $0x68] sm:$0xff]  ;;  %v876_v14 = vld [vmem:[%s1263_s1 + $0x60] sm:$0xff]  ;;  %v1035_v50 = vshrl.u32 %v163_v47, 7 }
   0xa   :  { %65 = vperm.xlu1 %736, %v823_v5   ;;  %60 = vperm.xlu0 %735, %v828_v6   ;;  %v883_v15 = vld [vmem:[%s1263_s1 + $0x78] sm:$0xff]  ;;  %v888_v16 = vld [vmem:[%s1263_s1 + $0x70] sm:$0xff]  ;;  %v895_v17 = vld [vmem:[%s1263_s1 + $0x88] sm:$0xff] }
   0xb   :  { %v900_v18 = vld [vmem:[%s1263_s1 + $0x80] sm:$0xff]  ;;  %v907_v19 = vld [vmem:[%s1263_s1 + $0x98] sm:$0xff]  ;;  %v912_v20 = vld [vmem:[%s1263_s1 + $0x90] sm:$0xff]  ;;  %v165_v53 = vsub.s32 0, %v1035_v50 }
   0xc   :  { %v919_v21 = vld [vmem:[%s1263_s1 + $0xa8] sm:$0xff]  ;;  %v924_v22 = vld [vmem:[%s1263_s1 + $0xa0] sm:$0xff]  ;;  %v931_v23 = vld [vmem:[%s1263_s1 + $0xb8] sm:$0xff] }
   0xd   :  { %v936_v24 = vld [vmem:[%s1263_s1 + $0xb0] sm:$0xff]  ;;  %v943_v25 = vld [vmem:[%s1263_s1 + $0xc0] sm:$0xff] }
   0xe   :  { %75 = vperm.xlu1 %736, %v835_v7   ;;  %70 = vperm.xlu0 %735, %v840_v8   ;;  %v1047_v54 = vld [vmem:[%s1262_s0] sm:$0x3]  ;;  %s780_s0 = smov [#allocation2]  }
   0xf   :  { %v1056_v57 = vrot.slane %v1047_v54, %v165_v53  ;;  %s721_s4 = sshll.u32 %s780_s0, 4  ;;  %s722_s4 = int_to_ptr.vmem [resolvable:$true] %s721_s4 }
  0x10   :  { %s751_s5 = scalar_lea.vmem %s722_s4, 16  ;;  %s755_s6 = scalar_lea.vmem %s722_s4, 32 }
  0x11   :  { %p752_p0 = scmp.ne.s32.totalorder %s722_s4, %s751_s5  ;;  %p756_p1 = scmp.lt.s32.totalorder %s722_s4, %s722_s4 }
  0x12   :  { %85 = vperm.xlu1 %736, %v847_v9   ;;  %80 = vperm.xlu0 %735, %v852_v10   ;;  %p757_p2 = scmp.lt.s32.totalorder %s755_s6, %s751_s5 }
  0x14   :  { %p758_p3 = por %p757_p2, %p756_p1 }
  0x16   :  { %95 = vperm.xlu1 %736, %v859_v11   ;;  %90 = vperm.xlu0 %735, %v864_v12   ;;  %p759_p4 = pnand %p758_p3, %p752_p0 }
  0x1a   :  { %105 = vperm.xlu1 %736, %v871_v13   ;;  %100 = vperm.xlu0 %735, %v876_v14  }
  0x1e   :  { %115 = vperm.xlu1 %736, %v883_v15   ;;  %110 = vperm.xlu0 %735, %v888_v16  }
  0x22   :  { %125 = vperm.xlu1 %736, %v895_v17   ;;  %120 = vperm.xlu0 %735, %v900_v18  }
  0x26   :  { %135 = vperm.xlu1 %736, %v907_v19   ;;  %130 = vperm.xlu0 %735, %v912_v20  }
  0x2a   :  { %145 = vperm.xlu1 %736, %v919_v21   ;;  %140 = vperm.xlu0 %735, %v924_v22  }
  0x2e   :  { %155 = vperm.xlu1 %736, %v931_v23   ;;  %150 = vperm.xlu0 %735, %v936_v24  }
  0x32   :  { %737 = vset.pattern.permute.xlu1 %v776_v26  ;;  %160 = vperm.xlu0 %735, %v943_v25  }
  0x33   :  { %193 = vperm.xlu1 %737, %v804_v1  }
  0x36   :  { %738 = vset.pattern.permute.xlu0 %v776_v26 }
  0x37   :  { %201 = vperm.xlu1 %737, %v799_v0   ;;  %197 = vperm.xlu0 %738, %v816_v4  }
  0x3b   :  { %205 = vperm.xlu1 %737, %v811_v3   ;;  %209 = vperm.xlu0 %738, %v828_v6  }
  0x3f   :  { %213 = vperm.xlu1 %737, %v823_v5   ;;  %217 = vperm.xlu0 %738, %v840_v8  }
  0x43   :  { %221 = vperm.xlu1 %737, %v835_v7   ;;  %225 = vperm.xlu0 %738, %v852_v10  }
  0x47   :  { %229 = vperm.xlu1 %737, %v847_v9   ;;  %233 = vperm.xlu0 %738, %v864_v12  }
  0x4b   :  { %237 = vperm.xlu1 %737, %v859_v11   ;;  %241 = vperm.xlu0 %738, %v876_v14  }
  0x4f   :  { %245 = vperm.xlu1 %737, %v871_v13   ;;  %249 = vperm.xlu0 %738, %v888_v16  }
  0x53   :  { %253 = vperm.xlu1 %737, %v883_v15   ;;  %257 = vperm.xlu0 %738, %v900_v18  }
  0x57   :  { %261 = vperm.xlu1 %737, %v895_v17   ;;  %265 = vperm.xlu0 %738, %v912_v20  }
  0x5b   :  { %269 = vperm.xlu1 %737, %v907_v19   ;;  %273 = vperm.xlu0 %738, %v924_v22  }
  0x5f   :  { %277 = vperm.xlu1 %737, %v919_v21   ;;  %281 = vperm.xlu0 %738, %v936_v24  }
  0x63   :  { %285 = vperm.xlu1 %737, %v931_v23   ;;  %289 = vperm.xlu0 %738, %v943_v25  }
  0x67   :  { %739 = vset.pattern.permute.xlu1 %v777_v27  ;;  %740 = vset.pattern.permute.xlu0 %v777_v27 }
  0x68   :  { %318 = vperm.xlu1 %739, %v804_v1   ;;  %322 = vperm.xlu0 %740, %v816_v4  }
  0x6c   :  { %326 = vperm.xlu1 %739, %v799_v0   ;;  %334 = vperm.xlu0 %740, %v828_v6  }
  0x70   :  { %330 = vperm.xlu1 %739, %v811_v3   ;;  %342 = vperm.xlu0 %740, %v840_v8  }
  0x74   :  { %338 = vperm.xlu1 %739, %v823_v5   ;;  %350 = vperm.xlu0 %740, %v852_v10  }
  0x78   :  { %346 = vperm.xlu1 %739, %v835_v7   ;;  %358 = vperm.xlu0 %740, %v864_v12  }
  0x7c   :  { %354 = vperm.xlu1 %739, %v847_v9   ;;  %741 = vset.pattern.permute.xlu0 %v778_v28 }
  0x7d   :  { %522 = vperm.xlu0 %741, %v804_v1  }
  0x80   :  { %362 = vperm.xlu1 %739, %v859_v11  }
  0x81   :  { %v985_v29 = vpop.permute.xlu1 %50  ;;  %534 = vperm.xlu0 %741, %v811_v3   ;;  %v41_v30 = vpop.permute.xlu0 %40 }
  0x82   :  { %v167_v58 = vmul.f32 %v1056_v57, %v41_v30  ;;  %v779_v30 = vmov 4  }
  0x84   :  { %742 = vset.pattern.permute.xlu1 %v778_v28 }
  0x85   :  { %v989_v31 = vpop.permute.xlu1 %55  ;;  %526 = vperm.xlu1 %742, %v816_v4   ;;  %542 = vperm.xlu0 %741, %v823_v5   ;;  %v46_v32 = vpop.permute.xlu0 %45 }
  0x86   :  { %v168_v62 = vmul.f32 %v1056_v57, %v46_v32 }
  0x89   :  { %v993_v33 = vpop.permute.xlu1 %65  ;;  %530 = vperm.xlu1 %742, %v799_v0   ;;  %550 = vperm.xlu0 %741, %v835_v7   ;;  %v61_v34 = vpop.permute.xlu0 %60 }
  0x8a   :  { %v171_v3 = vmul.f32 %v1056_v57, %v61_v34 }
  0x8d   :  { %v997_v35 = vpop.permute.xlu1 %75  ;;  %538 = vperm.xlu1 %742, %v828_v6   ;;  %554 = vperm.xlu0 %741, %v852_v10   ;;  %v71_v36 = vpop.permute.xlu0 %70 }
  0x8e   :  { %v173_v7 = vmul.f32 %v1056_v57, %v71_v36 }
  0x91   :  { %v1001_v37 = vpop.permute.xlu1 %85  ;;  %546 = vperm.xlu1 %742, %v840_v8   ;;  %558 = vperm.xlu0 %741, %v847_v9   ;;  %v81_v38 = vpop.permute.xlu0 %80 }
  0x95   :  { %v1005_v39 = vpop.permute.xlu1 %95  ;;  %743 = vset.pattern.permute.xlu1 %v777_v27  ;;  %562 = vperm.xlu0 %741, %v864_v12   ;;  %v1008_v40 = vpop.permute.xlu0 %90  ;;  %v175_v12 = vmul.f32 %v1056_v57, %v81_v38 }
  0x96   :  { %366 = vperm.xlu1 %743, %v876_v14   ;;  %v178_v26 = vmul.f32 %v1056_v57, %v1005_v39 }
  0x99   :  { %v1011_v41 = vpop.permute.xlu1 %105  ;;  %566 = vperm.xlu0 %741, %v859_v11   ;;  %v1014_v42 = vpop.permute.xlu0 %100  ;;  %v174_v11 = vmul.f32 %v1056_v57, %v997_v35 }
  0x9a   :  { %370 = vperm.xlu1 %743, %v871_v13   ;;  %v179_v27 = vmul.f32 %v1056_v57, %v1014_v42  ;;  %v180_v36 = vmul.f32 %v1056_v57, %v1011_v41 }
  0x9d   :  { %v1017_v43 = vpop.permute.xlu1 %115  ;;  %570 = vperm.xlu0 %741, %v876_v14   ;;  %v1020_v44 = vpop.permute.xlu0 %110 }
  0x9e   :  { %374 = vperm.xlu1 %743, %v888_v16  }
  0xa1   :  { %v1023_v45 = vpop.permute.xlu1 %125  ;;  %574 = vperm.xlu0 %741, %v871_v13   ;;  %v1026_v46 = vpop.permute.xlu0 %120 }
  0xa2   :  { %378 = vperm.xlu1 %743, %v883_v15  }
  0xa5   :  { %v1029_v48 = vpop.permute.xlu1 %135  ;;  %578 = vperm.xlu0 %741, %v888_v16   ;;  %v1032_v49 = vpop.permute.xlu0 %130 }
  0xa6   :  { %382 = vperm.xlu1 %743, %v900_v18  }
  0xa9   :  { %v1037_v51 = vpop.permute.xlu1 %145  ;;  %582 = vperm.xlu0 %741, %v883_v15   ;;  %v1040_v52 = vpop.permute.xlu0 %140 }
  0xaa   :  { %386 = vperm.xlu1 %743, %v895_v17  }
  0xad   :  { %v1049_v55 = vpop.permute.xlu1 %155  ;;  %586 = vperm.xlu0 %741, %v900_v18   ;;  %v1052_v56 = vpop.permute.xlu0 %150  ;;  %v177_v18 = vmul.f32 %v1056_v57, %v1008_v40 }
  0xae   :  { %390 = vperm.xlu1 %743, %v912_v20  }
  0xb1   :  { %590 = vperm.xlu0 %741, %v895_v17   ;;  %v1060_v59 = vpop.permute.xlu0 %160  ;;  %v176_v17 = vmul.f32 %v1056_v57, %v1001_v37  ;;  %v181_v37 = vmul.f32 %v1056_v57, %v1020_v44  ;;  %v184_v44 = vmul.f32 %v1056_v57, %v1023_v45 }
  0xb2   :  { %394 = vperm.xlu1 %743, %v907_v19   ;;  %v194_v60 = vpop.permute.xlu1 %193 }
  0xb3   :  { %v1063_v61 = vadd.f32 %v194_v60, %v167_v58 }
  0xb5   :  { %594 = vperm.xlu0 %741, %v912_v20  }
  0xb6   :  { %398 = vperm.xlu1 %743, %v924_v22   ;;  %v1068_v63 = vpop.permute.xlu1 %201  ;;  %v198_v0 = vpop.permute.xlu0 %197 }
  0xb7   :  { %v1070_v2 = vadd.f32 %v198_v0, %v168_v62  ;;  %v186_v0 = vmul.f32 %v1056_v57, %v1029_v48 }
  0xb9   :  { %598 = vperm.xlu0 %741, %v907_v19  }
  0xba   :  { %402 = vperm.xlu1 %743, %v919_v21   ;;  %v1075_v4 = vpop.permute.xlu1 %205  ;;  %v210_v5 = vpop.permute.xlu0 %209 }
  0xbb   :  { %v1077_v6 = vadd.f32 %v210_v5, %v171_v3  ;;  %v187_v3 = vmul.f32 %v1056_v57, %v1040_v52  ;;  %v190_v52 = vmul.f32 %v1056_v57, %v1049_v55 }
  0xbd   :  { %602 = vperm.xlu0 %741, %v924_v22  }
  0xbe   :  { %406 = vperm.xlu1 %743, %v936_v24   ;;  %v1082_v8 = vpop.permute.xlu1 %213  ;;  %v218_v9 = vpop.permute.xlu0 %217 }
  0xbf   :  { %v1084_v10 = vadd.f32 %v218_v9, %v173_v7  ;;  %v189_v9 = vmul.f32 %v1056_v57, %v1052_v56 }
  0xc1   :  { %610 = vperm.xlu0 %741, %v936_v24  }
  0xc2   :  { %410 = vperm.xlu1 %743, %v931_v23   ;;  %v222_v13 = vpop.permute.xlu1 %221  ;;  %v226_v14 = vpop.permute.xlu0 %225 }
  0xc3   :  { %v1091_v15 = vadd.f32 %v222_v13, %v174_v11  ;;  %v1093_v16 = vadd.f32 %v226_v14, %v175_v12  ;;  %v191_v14 = vmul.f32 %v1056_v57, %v1060_v59 }
  0xc5   :  { %618 = vperm.xlu0 %741, %v943_v25  }
  0xc6   :  { %414 = vperm.xlu1 %743, %v943_v25   ;;  %v230_v19 = vpop.permute.xlu1 %229  ;;  %v234_v20 = vpop.permute.xlu0 %233 }
  0xc7   :  { %v1101_v22 = vadd.f32 %v230_v19, %v176_v17  ;;  %v1103_v24 = vadd.f32 %v234_v20, %v177_v18 }
  0xc9   :  { %746 = vset.pattern.permute.xlu0 %v779_v30 }
  0xca   :  { %744 = vset.pattern.permute.xlu1 %v778_v28  ;;  %v238_v32 = vpop.permute.xlu1 %237  ;;  %v242_v34 = vpop.permute.xlu0 %241  ;;  %v182_v28 = vmul.f32 %v1056_v57, %v1017_v43 }
  0xcb   :  { %v1110_v35 = vadd.f32 %v238_v32, %v178_v26  ;;  %v1112_v25 = vadd.f32 %v242_v34, %v179_v27  ;;  %606 = vperm.xlu1 %744, %v919_v21   ;;  %v183_v21 = vmul.f32 %v1056_v57, %v1026_v46 }
  0xce   :  { %v246_v38 = vpop.permute.xlu1 %245  ;;  %v250_v39 = vpop.permute.xlu0 %249 }
  0xcf   :  { %v1119_v40 = vadd.f32 %v246_v38, %v180_v36  ;;  %v1121_v42 = vadd.f32 %v250_v39, %v181_v37  ;;  %614 = vperm.xlu1 %744, %v931_v23   ;;  %v185_v23 = vmul.f32 %v1056_v57, %v1032_v49  ;;  %v188_v49 = vmul.f32 %v1056_v57, %v1037_v51 }
  0xd2   :  { %v254_v47 = vpop.permute.xlu1 %253  ;;  %v258_v53 = vpop.permute.xlu0 %257 }
  0xd3   :  { %v1128_v41 = vadd.f32 %v254_v47, %v182_v28  ;;  %v1130_v58 = vadd.f32 %v258_v53, %v183_v21  ;;  %745 = vset.pattern.permute.xlu1 %v779_v30  ;;  %v419_v30 = vsub.s32 1, %v1035_v50  ;;  %v169_v47 = vmul.f32 %v1056_v57, %v985_v29 }
  0xd4   :  { %703 = vperm.xlu1 %745, %v804_v1   ;;  %v170_v50 = vmul.f32 %v1056_v57, %v989_v31  ;;  %v172_v29 = vmul.f32 %v1056_v57, %v993_v33 }
  0xd5   :  { %v1167_v36 = vrot.slane %v1047_v54, %v419_v30 }
  0xd6   :  { %v262_v60 = vpop.permute.xlu1 %261  ;;  %v266_v43 = vpop.permute.xlu0 %265 }
  0xd7   :  { %v1137_v62 = vadd.f32 %v262_v60, %v184_v44  ;;  %v1139_v46 = vadd.f32 %v266_v43, %v185_v23  ;;  %v294_v60 = vadd.f32 %v1068_v63, %v169_v47  ;;  %v295_v43 = vadd.f32 %v1075_v4, %v170_v50 }
  0xda   :  { %v270_v5 = vpop.permute.xlu1 %269  ;;  %v274_v1 = vpop.permute.xlu0 %273 }
  0xdb   :  { %v1145_v7 = vadd.f32 %v270_v5, %v186_v0  ;;  %v1147_v45 = vadd.f32 %v274_v1, %v187_v3 }
  0xde   :  { %v278_v11 = vpop.permute.xlu1 %277  ;;  %v282_v12 = vpop.permute.xlu0 %281 }
  0xdf   :  { %v1153_v13 = vadd.f32 %v278_v11, %v188_v49  ;;  %v1155_v48 = vadd.f32 %v282_v12, %v189_v9 }
  0xe2   :  { %v286_v17 = vpop.permute.xlu1 %285  ;;  %v290_v18 = vpop.permute.xlu0 %289 }
  0xe3   :  { %v1161_v19 = vadd.f32 %v286_v17, %v190_v52  ;;  %v1163_v51 = vadd.f32 %v290_v18, %v191_v14 }
  0xe7   :  { %v319_v20 = vpop.permute.xlu1 %318  ;;  %v323_v56 = vpop.permute.xlu0 %322 }
  0xe8   :  { %v421_v59 = vmul.f32 %v1167_v36, %v319_v20  ;;  %v422_v38 = vmul.f32 %v1167_v36, %v323_v56 }
  0xea   :  { %v446_v21 = vadd.f32 %v421_v59, %v1063_v61  ;;  %v447_v44 = vadd.f32 %v422_v38, %v1070_v2  ;;  %v297_v2 = vadd.f32 %v1082_v8, %v172_v29 }
  0xeb   :  { %v327_v26 = vpop.permute.xlu1 %326  ;;  %v335_v27 = vpop.permute.xlu0 %334 }
  0xec   :  { %v423_v53 = vmul.f32 %v1167_v36, %v327_v26  ;;  %v425_v61 = vmul.f32 %v1167_v36, %v335_v27  ;;  %v471_v3 = vmax.f32 %v446_v21, 0.0  ;;  %v472_v9 = vmax.f32 %v447_v44, 0.0 }
  0xee   :  { %v448_v5 = vadd.f32 %v423_v53, %v294_v60  ;;  %v450_v63 = vadd.f32 %v425_v61, %v1077_v6  ;;  %v496_v12 = vmin.f32 %v471_v3, 6.0  ;;  %v497_v57 = vmin.f32 %v472_v9, 6.0 }
  0xef   :  { %v331_v32 = vpop.permute.xlu1 %330  ;;  %v343_v34 = vpop.permute.xlu0 %342 }
  0xf0   :  { %v424_v54 = vmul.f32 %v1167_v36, %v331_v32  ;;  %v427_v4 = vmul.f32 %v1167_v36, %v343_v34  ;;  %v473_v17 = vmax.f32 %v448_v5, 0.0  ;;  %v475_v8 = vmax.f32 %v450_v63, 0.0 }
  0xf2   :  { %v449_v31 = vadd.f32 %v424_v54, %v295_v43  ;;  %v452_v30 = vadd.f32 %v427_v4, %v1084_v10  ;;  %v500_v60 = vmin.f32 %v475_v8, 6.0 }
  0xf3   :  { %v339_v55 = vpop.permute.xlu1 %338  ;;  %v351_v37 = vpop.permute.xlu0 %350 }
  0xf4   :  { %v426_v1 = vmul.f32 %v1167_v36, %v339_v55  ;;  %v474_v14 = vmax.f32 %v449_v31, 0.0  ;;  %v429_v20 = vmul.f32 %v1167_v36, %v351_v37  ;;  %v498_v55 = vmin.f32 %v473_v17, 6.0 }
  0xf5   :  { %v477_v43 = vmax.f32 %v452_v30, 0.0 }
  0xf6   :  { %v451_v52 = vadd.f32 %v426_v1, %v297_v2  ;;  %v499_v6 = vmin.f32 %v474_v14, 6.0  ;;  %v454_v37 = vadd.f32 %v429_v20, %v1093_v16 }
  0xf7   :  { %v347_v39 = vpop.permute.xlu1 %346  ;;  %v359_v28 = vpop.permute.xlu0 %358 }
  0xf8   :  { %v428_v18 = vmul.f32 %v1167_v36, %v347_v39  ;;  %v476_v32 = vmax.f32 %v451_v52, 0.0  ;;  %v431_v53 = vmul.f32 %v1167_v36, %v359_v28  ;;  %v479_v5 = vmax.f32 %v454_v37, 0.0 }
  0xfa   :  { %v453_v34 = vadd.f32 %v428_v18, %v1091_v15  ;;  %v501_v44 = vmin.f32 %v476_v32, 6.0  ;;  %v456_v31 = vadd.f32 %v431_v53, %v1103_v24  ;;  %v504_v52 = vmin.f32 %v479_v5, 6.0 }
  0xfb   :  { %v355_v23 = vpop.permute.xlu1 %354 }
  0xfc   :  { %v523_v0 = vpop.permute.xlu0 %522  ;;  %v430_v59 = vmul.f32 %v1167_v36, %v355_v23  ;;  %v478_v61 = vmax.f32 %v453_v34, 0.0 }
  0xfd   :  { %v621_v33 = vmul.f32 %v523_v0, %v496_v12 }
  0xfe   :  { %v455_v15 = vadd.f32 %v430_v59, %v1101_v22  ;;  %v503_v22 = vmin.f32 %v478_v61, 6.0 }
  0xff   :  { %v363_v49 = vpop.permute.xlu1 %362  ;;  %v647_v38 = vsel %vm646_vm0, %v621_v33, 0.0 }
 0x100   :  { %v535_v11 = vpop.permute.xlu0 %534  ;;  %v432_v23 = vmul.f32 %v1167_v36, %v363_v49  ;;  %v480_v12 = vmax.f32 %v455_v15, 0.0 }
 0x101   :  { %v624_v54 = vmul.f32 %v535_v11, %v499_v6  ;;  %v502_v11 = vmin.f32 %v477_v43, 6.0 }
 0x102   :  { %v457_v63 = vadd.f32 %v432_v23, %v1110_v35 }
 0x103   :  { %v652_v28 = vsel %vm646_vm0, %v624_v54, 0.0 }
 0x104   :  { %v527_v56 = vpop.permute.xlu1 %526  ;;  %v543_v26 = vpop.permute.xlu0 %542  ;;  %v482_v8 = vmax.f32 %v457_v63, 0.0 }
 0x105   :  { %v622_v27 = vmul.f32 %v527_v56, %v497_v57  ;;  %v626_v1 = vmul.f32 %v543_v26, %v501_v44  ;;  %v481_v57 = vmax.f32 %v456_v31, 0.0 }
 0x107   :  { %v648_v39 = vsel %vm646_vm0, %v622_v27, 0.0  ;;  %v656_v18 = vsel %vm646_vm0, %v626_v1, 0.0  ;;  %v505_v27 = vmin.f32 %v480_v12, 6.0 }
 0x108   :  { %v649_v21 = vadd.f32 %v648_v39, %v647_v38  ;;  %v531_v47 = vpop.permute.xlu1 %530  ;;  %v551_v50 = vpop.permute.xlu0 %550 }
 0x109   :  { %v623_v10 = vmul.f32 %v531_v47, %v498_v55  ;;  %v628_v33 = vmul.f32 %v551_v50, %v503_v22  ;;  %v506_v55 = vmin.f32 %v481_v57, 6.0 }
 0x10b   :  { %v650_v0 = vsel %vm646_vm0, %v623_v10, 0.0  ;;  %v660_v6 = vsel %vm646_vm0, %v628_v33, 0.0 }
 0x10c   :  { %v651_v3 = vadd.f32 %v650_v0, %v649_v21  ;;  %v539_v29 = vpop.permute.xlu1 %538  ;;  %v555_v16 = vpop.permute.xlu0 %554  ;;  %v507_v21 = vmin.f32 %v482_v8, 6.0 }
 0x10d   :  { %v625_v9 = vmul.f32 %v539_v29, %v500_v60  ;;  %v629_v56 = vmul.f32 %v555_v16, %v504_v52 }
 0x10e   :  { %v653_v2 = vadd.f32 %v652_v28, %v651_v3 }
 0x10f   :  { %v654_v49 = vsel %vm646_vm0, %v625_v9, 0.0  ;;  %v662_v39 = vsel %vm646_vm0, %v629_v56, 0.0 }
 0x110   :  { %v655_v4 = vadd.f32 %v654_v49, %v653_v2  ;;  %v547_v14 = vpop.permute.xlu1 %546  ;;  %v559_v17 = vpop.permute.xlu0 %558 }
 0x111   :  { %v627_v24 = vmul.f32 %v547_v14, %v502_v11  ;;  %v630_v32 = vmul.f32 %v559_v17, %v505_v27 }
 0x112   :  { %v657_v20 = vadd.f32 %v656_v18, %v655_v4 }
 0x113   :  { %v658_v26 = vsel %vm646_vm0, %v627_v24, 0.0  ;;  %v664_v54 = vsel %vm646_vm0, %v630_v32, 0.0 }
 0x114   :  { %v659_v35 = vadd.f32 %v658_v26, %v657_v20  ;;  %v563_v30 = vpop.permute.xlu0 %562 }
 0x115   :  { %v367_v34 = vpop.permute.xlu1 %366  ;;  %v631_v37 = vmul.f32 %v563_v30, %v506_v55 }
 0x116   :  { %v661_v59 = vadd.f32 %v660_v6, %v659_v35  ;;  %v433_v38 = vmul.f32 %v1167_v36, %v367_v34 }
 0x117   :  { %v666_v23 = vsel %vm646_vm0, %v631_v37, 0.0 }
 0x118   :  { %v663_v47 = vadd.f32 %v662_v39, %v661_v59  ;;  %v458_v50 = vadd.f32 %v433_v38, %v1112_v25  ;;  %v567_v53 = vpop.permute.xlu0 %566 }
 0x119   :  { %v632_v10 = vmul.f32 %v567_v53, %v507_v21  ;;  %v371_v44 = vpop.permute.xlu1 %370 }
 0x11a   :  { %v665_v60 = vadd.f32 %v664_v54, %v663_v47  ;;  %v434_v43 = vmul.f32 %v1167_v36, %v371_v44  ;;  %v483_v15 = vmax.f32 %v458_v50, 0.0 }
 0x11b   :  { %v668_v16 = vsel %vm646_vm0, %v632_v10, 0.0 }
 0x11c   :  { %v667_v0 = vadd.f32 %v666_v23, %v665_v60  ;;  %v459_v61 = vadd.f32 %v434_v43, %v1119_v40  ;;  %v571_v3 = vpop.permute.xlu0 %570  ;;  %v508_v29 = vmin.f32 %v483_v15, 6.0 }
 0x11d   :  { %v375_v5 = vpop.permute.xlu1 %374 }
 0x11e   :  { %v669_v25 = vadd.f32 %v668_v16, %v667_v0  ;;  %v633_v31 = vmul.f32 %v571_v3, %v508_v29  ;;  %v435_v28 = vmul.f32 %v1167_v36, %v375_v5  ;;  %v484_v1 = vmax.f32 %v459_v61, 0.0 }
 0x120   :  { %v670_v9 = vsel %vm646_vm0, %v633_v31, 0.0  ;;  %v460_v2 = vadd.f32 %v435_v28, %v1121_v42  ;;  %v575_v11 = vpop.permute.xlu0 %574  ;;  %v509_v63 = vmin.f32 %v484_v1, 6.0 }
 0x121   :  { %v671_v22 = vadd.f32 %v670_v9, %v669_v25  ;;  %v379_v49 = vpop.permute.xlu1 %378 }
 0x122   :  { %v634_v12 = vmul.f32 %v575_v11, %v509_v63  ;;  %v436_v40 = vmul.f32 %v1167_v36, %v379_v49  ;;  %v485_v4 = vmax.f32 %v460_v2, 0.0 }
 0x124   :  { %v672_v52 = vsel %vm646_vm0, %v634_v12, 0.0  ;;  %v461_v14 = vadd.f32 %v436_v40, %v1128_v41  ;;  %v579_v17 = vpop.permute.xlu0 %578  ;;  %v510_v18 = vmin.f32 %v485_v4, 6.0 }
 0x125   :  { %v673_v33 = vadd.f32 %v672_v52, %v671_v22  ;;  %v383_v24 = vpop.permute.xlu1 %382 }
 0x126   :  { %v635_v57 = vmul.f32 %v579_v17, %v510_v18  ;;  %v437_v20 = vmul.f32 %v1167_v36, %v383_v24  ;;  %v486_v42 = vmax.f32 %v461_v14, 0.0 }
 0x128   :  { %v674_v56 = vsel %vm646_vm0, %v635_v57, 0.0  ;;  %v462_v26 = vadd.f32 %v437_v20, %v1130_v58  ;;  %v583_v27 = vpop.permute.xlu0 %582  ;;  %v511_v8 = vmin.f32 %v486_v42, 6.0 }
 0x129   :  { %v675_v35 = vadd.f32 %v674_v56, %v673_v33  ;;  %v387_v30 = vpop.permute.xlu1 %386 }
 0x12a   :  { %v636_v6 = vmul.f32 %v583_v27, %v511_v8  ;;  %v438_v32 = vmul.f32 %v1167_v36, %v387_v30  ;;  %v487_v41 = vmax.f32 %v462_v26, 0.0 }
 0x12c   :  { %v676_v55 = vsel %vm646_vm0, %v636_v6, 0.0  ;;  %v463_v34 = vadd.f32 %v438_v32, %v1137_v62  ;;  %v587_v59 = vpop.permute.xlu0 %586  ;;  %v512_v38 = vmin.f32 %v487_v41, 6.0 }
 0x12d   :  { %v677_v39 = vadd.f32 %v676_v55, %v675_v35  ;;  %v391_v37 = vpop.permute.xlu1 %390 }
 0x12e   :  { %v637_v21 = vmul.f32 %v587_v59, %v512_v38  ;;  %v439_v47 = vmul.f32 %v1167_v36, %v391_v37  ;;  %v488_v58 = vmax.f32 %v463_v34, 0.0 }
 0x130   :  { %v678_v50 = vsel %vm646_vm0, %v637_v21, 0.0  ;;  %v464_v53 = vadd.f32 %v439_v47, %v1139_v46  ;;  %v591_v54 = vpop.permute.xlu0 %590  ;;  %v513_v10 = vmin.f32 %v488_v58, 6.0 }
 0x131   :  { %v679_v44 = vadd.f32 %v678_v50, %v677_v39  ;;  %v395_v60 = vpop.permute.xlu1 %394 }
 0x132   :  { %v638_v43 = vmul.f32 %v591_v54, %v513_v10  ;;  %v440_v15 = vmul.f32 %v1167_v36, %v395_v60  ;;  %v489_v62 = vmax.f32 %v464_v53, 0.0 }
 0x134   :  { %v680_v23 = vsel %vm646_vm0, %v638_v43, 0.0  ;;  %v465_v0 = vadd.f32 %v440_v15, %v1145_v7  ;;  %v595_v61 = vpop.permute.xlu0 %594  ;;  %v514_v3 = vmin.f32 %v489_v62, 6.0 }
 0x135   :  { %v681_v29 = vadd.f32 %v680_v23, %v679_v44  ;;  %v399_v16 = vpop.permute.xlu1 %398 }
 0x136   :  { %v639_v5 = vmul.f32 %v595_v61, %v514_v3  ;;  %v441_v25 = vmul.f32 %v1167_v36, %v399_v16  ;;  %v490_v46 = vmax.f32 %v465_v0, 0.0 }
 0x138   :  { %v682_v31 = vsel %vm646_vm0, %v639_v5, 0.0  ;;  %v466_v28 = vadd.f32 %v441_v25, %v1147_v45  ;;  %v599_v1 = vpop.permute.xlu0 %598  ;;  %v515_v9 = vmin.f32 %v490_v46, 6.0 }
 0x139   :  { %v683_v2 = vadd.f32 %v682_v31, %v681_v29  ;;  %v403_v11 = vpop.permute.xlu1 %402 }
 0x13a   :  { %v640_v63 = vmul.f32 %v599_v1, %v515_v9  ;;  %v491_v22 = vmax.f32 %v466_v28, 0.0  ;;  %v442_v4 = vmul.f32 %v1167_v36, %v403_v11 }
 0x13c   :  { %v684_v7 = vsel %vm646_vm0, %v640_v63, 0.0  ;;  %v603_v49 = vpop.permute.xlu0 %602  ;;  %v516_v12 = vmin.f32 %v491_v22, 6.0  ;;  %v467_v33 = vadd.f32 %v442_v4, %v1153_v13 }
 0x13d   :  { %v685_v40 = vadd.f32 %v684_v7, %v683_v2  ;;  %v407_v52 = vpop.permute.xlu1 %406 }
 0x13e   :  { %v641_v14 = vmul.f32 %v603_v49, %v516_v12  ;;  %v443_v17 = vmul.f32 %v1167_v36, %v407_v52  ;;  %v492_v27 = vmax.f32 %v467_v33, 0.0 }
 0x140   :  { %v686_v18 = vsel %vm646_vm0, %v641_v14, 0.0  ;;  %v468_v45 = vadd.f32 %v443_v17, %v1155_v48  ;;  %v611_v30 = vpop.permute.xlu0 %610  ;;  %v517_v32 = vmin.f32 %v492_v27, 6.0 }
 0x141   :  { %v687_v24 = vadd.f32 %v686_v18, %v685_v40  ;;  %v411_v57 = vpop.permute.xlu1 %410 }
 0x142   :  { %v444_v20 = vmul.f32 %v1167_v36, %v411_v57  ;;  %v493_v42 = vmax.f32 %v468_v45, 0.0 }
 0x144   :  { %v469_v56 = vadd.f32 %v444_v20, %v1161_v19  ;;  %v518_v35 = vmin.f32 %v493_v42, 6.0  ;;  %v619_v37 = vpop.permute.xlu0 %618 }
 0x145   :  { %v415_v26 = vpop.permute.xlu1 %414 }
 0x146   :  { %v445_v8 = vmul.f32 %v1167_v36, %v415_v26  ;;  %v494_v41 = vmax.f32 %v469_v56, 0.0  ;;  %v643_v13 = vmul.f32 %v611_v30, %v518_v35 }
 0x148   :  { %v470_v6 = vadd.f32 %v445_v8, %v1163_v51  ;;  %v519_v39 = vmin.f32 %v494_v41, 6.0  ;;  %v690_v47 = vsel %vm646_vm0, %v643_v13, 0.0 }
 0x14a   :  { %v495_v48 = vmax.f32 %v470_v6, 0.0  ;;  %v607_v55 = vpop.permute.xlu1 %606 }
 0x14b   :  { %v642_v34 = vmul.f32 %v607_v55, %v517_v32 }
 0x14c   :  { %v520_v59 = vmin.f32 %v495_v48, 6.0 }
 0x14d   :  { %v688_v38 = vsel %vm646_vm0, %v642_v34, 0.0 }
 0x14e   :  { %v689_v19 = vadd.f32 %v688_v38, %v687_v24  ;;  %v615_v21 = vpop.permute.xlu1 %614  ;;  %v645_v36 = vmul.f32 %v619_v37, %v520_v59 }
 0x14f   :  { %v644_v58 = vmul.f32 %v615_v21, %v519_v39 }
 0x150   :  { %v691_v50 = vadd.f32 %v690_v47, %v689_v19  ;;  %v694_v54 = vsel %vm646_vm0, %v645_v36, 0.0 }
 0x151   :  { %v692_v51 = vsel %vm646_vm0, %v644_v58, 0.0 }
 0x152   :  { %v693_v53 = vadd.f32 %v692_v51, %v691_v50 }
 0x153   :  { %v704_v23 = vpop.permute.xlu1 %703 }
 0x154   :  { %v695_v10 = vadd.f32 %v694_v54, %v693_v53 }
 0x156   :  { %v696_v44 = vrot.slane %v695_v10, 4 }
 0x158   :  { %v697_v60 = vadd.f32 %v696_v44, %v695_v10 }
 0x15a   :  { %v698_v43 = vrot.slane %v697_v60, 2 }
 0x15c   :  { %v699_v15 = vadd.f32 %v698_v43, %v697_v60 }
 0x15e   :  { %v700_v62 = vrot.slane %v699_v15, 1 }
 0x160   :  { %v701_v0 = vadd.f32 %v700_v62, %v699_v15 }
 0x162   :  { %v706_v61 = vadd.f32 %v704_v23, %v701_v0 }
 0x164   :  { %v707_v3 = vsub.f32 %v706_v61, %v706_v61 }
 0x166   :  { %v708_v29 = vmul.f32 1.442695, %v707_v3 }
 0x168   :  { %747 = vpow2.f32 %v708_v29 }
 0x172   :  { %v748_v16 = vpop.eup %747 }
 0x173   :  { %749 = vrcp.f32 %v748_v16 }
 0x17d   :  { %v750_v5 = vpop.eup %749 }
 0x17e   :  { %v712_v25 = vmul.f32 %v750_v5, %v748_v16 }
 0x180   :  { %714 = vst.msk [vmem:[#allocation2] sm:$0x1] %vm713_vm1, %v712_v25 }
 0x181   :  { %762 = shalt.err (!%p759_p4)
}
 0x182   :  { %s763_s9 = scalar_lea.hbm %s1264_s2, 16 }
 0x183   :  { %p764_p5 = scmp.ne.s32.totalorder %s1264_s2, %s763_s9  ;;  %p767_p6 = scmp.lt.u32.totalorder %s763_s9, %s1264_s2 }
 0x185   :  { %p769_p7 = pnand %p767_p6, %p764_p5 }
 0x187   :  { %772 = shalt.err (!%p769_p7)
}
 0x188   :  { %724 = dma.vmem_to_hbm [thread:$0]  %s722_s4, 16, %s1264_s2, [#allocation3]  }
 0x189   :  { %773 = dma.done.wait [#allocation3], 16  }
 0x18a   :  { %774 = vsyncadd [#allocation3], 4294967280 }
 0x18b   :  { %728 = vsyncpa [#allocation3], 1 }

</bundles_post_ra>
